<compile_context>
chip_gen: v5e
topology: v5e:2x2
jax: 0.10.0
libtpu: 0.0.40
codegen_flags: <defaults>
</compile_context>

<pallas_src>
import math
import functools

import jax
import jax.numpy as jnp
from jax import lax
from jax.experimental import pallas as pl
from jax.experimental.pallas import tpu as pltpu


# --------------------------------------------------------------------------------------
# Kernel 1: QKV projection  (x @ W_in^T + b_in), K-streamed, head-split epilogue
# --------------------------------------------------------------------------------------
def _qkv_proj_kernel(x_ref, w_ref, b_ref, q_ref, k_ref, v_ref, acc_ref, *,
                     n_heads, d_head, scale):
    kk = pl.program_id(2)

    @pl.when(kk == 0)
    def _init():
        acc_ref[...] = jnp.zeros_like(acc_ref)

    # MXU matmul in the input dtype (bf16 stays bf16); accumulate in f32.
    acc_ref[...] += jnp.dot(x_ref[...], w_ref[...], preferred_element_type=jnp.float32)

    @pl.when(kk == pl.num_programs(2) - 1)
    def _finalize():
        d = n_heads * d_head
        qkv = acc_ref[...] + b_ref[...]                     # (Tm, 3D), f32
        # Head split hoisted out of the O(S^2) attention path: done once per token tile here.
        # The 1/sqrt(d_head) scale is folded into q (cheaper than scaling (S,S) scores).
        for h in range(n_heads):
            lo = h * d_head
            q_ref[h] = (qkv[:, lo:lo + d_head] * scale).astype(q_ref.dtype)
            k_ref[h] = qkv[:, d + lo:d + lo + d_head].astype(k_ref.dtype)
            v_ref[h] = qkv[:, 2 * d + lo:2 * d + lo + d_head].astype(v_ref.dtype)


# --------------------------------------------------------------------------------------
# Kernel 2: flash attention with online softmax (per batch, per head, per q tile)
# --------------------------------------------------------------------------------------
def _flash_attn_kernel(q_ref, k_ref, v_ref, o_ref, m_sc, l_sc, acc_sc, *,
                       causal, block_q, block_kv):
    qi = pl.program_id(2)
    ki = pl.program_id(3)

    @pl.when(ki == 0)
    def _init():
        m_sc[...] = jnp.full_like(m_sc, -jnp.inf)
        l_sc[...] = jnp.zeros_like(l_sc)
        acc_sc[...] = jnp.zeros_like(acc_sc)

    def _update():
        # q was pre-scaled by 1/sqrt(d_head) in the projection kernel.
        s = lax.dot_general(q_ref[...], k_ref[...], (((1,), (1,)), ((), ())),
                            preferred_element_type=jnp.float32)          # (Tq, Tkv)
        if causal:
            row = qi * block_q + lax.broadcasted_iota(jnp.int32, s.shape, 0)
            col = ki * block_kv + lax.broadcasted_iota(jnp.int32, s.shape, 1)
            # Large finite negative (not -inf) so fully-masked rows never produce NaN.
            s = jnp.where(col > row, jnp.float32(-1e30), s)

        m_prev = m_sc[...]
        m_new = jnp.maximum(m_prev, jnp.max(s, axis=-1, keepdims=True))
        alpha = jnp.exp(m_prev - m_new)
        p = jnp.exp(s - m_new)
        l_sc[...] = alpha * l_sc[...] + jnp.sum(p, axis=-1, keepdims=True)
        acc_sc[...] = alpha * acc_sc[...] + jnp.dot(
            p.astype(v_ref.dtype), v_ref[...], preferred_element_type=jnp.float32)
        m_sc[...] = m_new

    if causal:
        # Skip kv tiles that lie strictly in the future of every query row of this q tile.
        pl.when(ki * block_kv <= qi * block_q + (block_q - 1))(_update)
    else:
        _update()

    @pl.when(ki == pl.num_programs(3) - 1)
    def _finalize():
        # Deferred normalization: one O(Tq*d_head) multiply with an EUP approx reciprocal.
        o_ref[...] = (acc_sc[...] * pl.reciprocal(l_sc[...], approx=True)).astype(o_ref.dtype)


# --------------------------------------------------------------------------------------
# Kernel 3: output projection, contraction streamed per head (W_out never fully resident)
# --------------------------------------------------------------------------------------
def _out_proj_kernel(attn_ref, w_ref, b_ref, o_ref, acc_ref):
    h = pl.program_id(2)

    @pl.when(h == 0)
    def _init():
        acc_ref[...] = jnp.zeros_like(acc_ref)

    # (Tm, d_head) @ (d_head, D) accumulated in f32.
    acc_ref[...] += jnp.dot(attn_ref[...], w_ref[...], preferred_element_type=jnp.float32)

    @pl.when(h == pl.num_programs(2) - 1)
    def _finalize():
        o_ref[...] = (acc_ref[...] + b_ref[...]).astype(o_ref.dtype)


# --------------------------------------------------------------------------------------
# Wrappers
# --------------------------------------------------------------------------------------
def prepare_params(w_in, b_in, w_out, b_out, *, n_heads):
    """One-time parameter preparation (hoisted out of the per-call path).

    w_in: (3D, D), b_in: (3D,), w_out: (D, D), b_out: (D,)  [PyTorch nn.Linear layout]
    """
    d_embed = w_out.shape[0]
    assert d_embed % n_heads == 0
    d_head = d_embed // n_heads
    w_in_t = jnp.transpose(w_in)                                   # (D, 3D)
    w_out_heads = jnp.transpose(w_out).reshape(n_heads, d_head, d_embed)  # (H, dh, D)
    return (w_in_t, b_in.reshape(1, -1), w_out_heads, b_out.reshape(1, -1))


def _pick_tile(dim, target):
    """Full dim at small sizes; otherwise the target tile (must divide)."""
    if dim <= target:
        return dim
    assert dim % target == 0, f"dimension {dim} must be a multiple of tile {target}"
    return target


def self_attention(x, params, *, n_heads, causal_mask=False,
                   block_q=256, block_kv=512, block_m=256, block_k=512):
    """x: (B, S, D); params from prepare_params(). Tiles sized for <=32 MiB scoped VMEM
    (fits v5e/v6e/v7x double-buffered without raising the limit)."""
    w_in_t, b_in2, w_out_heads, b_out2 = params
    B, S, D = x.shape
    assert D % n_heads == 0
    d_head = D // n_heads
    dtype = x.dtype

    tq = _pick_tile(S, block_q)
    tkv = _pick_tile(S, block_kv)
    tm = _pick_tile(S, block_m)
    tk = _pick_tile(D, block_k)

    # ---- 1) QKV projection: grid (B, token tiles, K tiles of D) ----
    qkv_kernel = functools.partial(
        _qkv_proj_kernel, n_heads=n_heads, d_head=d_head, scale=1.0 / math.sqrt(d_head))
    q, k, v = pl.pallas_call(
        qkv_kernel,
        out_shape=tuple(jax.ShapeDtypeStruct((B, n_heads, S, d_head), dtype) for _ in range(3)),
        grid_spec=pltpu.PrefetchScalarGridSpec(
            num_scalar_prefetch=0,
            grid=(B, S // tm, D // tk),
            in_specs=[
                pl.BlockSpec((None, tm, tk), lambda b, m, kk: (b, m, kk)),   # x
                pl.BlockSpec((tk, 3 * D), lambda b, m, kk: (kk, 0)),         # W_in^T (K-streamed)
                pl.BlockSpec((1, 3 * D), lambda b, m, kk: (0, 0)),           # b_in
            ],
            out_specs=tuple(
                pl.BlockSpec((None, n_heads, tm, d_head), lambda b, m, kk: (b, 0, m, 0))
                for _ in range(3)),
            scratch_shapes=[pltpu.VMEM((tm, 3 * D), jnp.float32)],
        ),
        compiler_params=pltpu.CompilerParams(
            dimension_semantics=("parallel", "parallel", "arbitrary")),
    )(x, w_in_t, b_in2)

    # ---- 2) flash attention: grid (B, H, q tiles, kv tiles) ----
    flash_kernel = functools.partial(
        _flash_attn_kernel, causal=causal_mask, block_q=tq, block_kv=tkv)
    attn = pl.pallas_call(
        flash_kernel,
        out_shape=jax.ShapeDtypeStruct((B, n_heads, S, d_head), dtype),
        grid_spec=pltpu.PrefetchScalarGridSpec(
            num_scalar_prefetch=0,
            grid=(B, n_heads, S // tq, S // tkv),
            in_specs=[
                pl.BlockSpec((None, None, tq, d_head), lambda b, h, qi, ki: (b, h, qi, 0)),
                pl.BlockSpec((None, None, tkv, d_head), lambda b, h, qi, ki: (b, h, ki, 0)),
                pl.BlockSpec((None, None, tkv, d_head), lambda b, h, qi, ki: (b, h, ki, 0)),
            ],
            out_specs=pl.BlockSpec((None, None, tq, d_head), lambda b, h, qi, ki: (b, h, qi, 0)),
            scratch_shapes=[
                pltpu.VMEM((tq, 1), jnp.float32),        # m (running max)
                pltpu.VMEM((tq, 1), jnp.float32),        # l (running denom)
                pltpu.VMEM((tq, d_head), jnp.float32),   # acc (unnormalized output)
            ],
        ),
        compiler_params=pltpu.CompilerParams(
            dimension_semantics=("parallel", "parallel", "parallel", "arbitrary")),
    )(q, k, v)

    # ---- 3) output projection: grid (B, token tiles, heads); heads are the contraction ----
    out = pl.pallas_call(
        _out_proj_kernel,
        out_shape=jax.ShapeDtypeStruct((B, S, D), dtype),
        grid_spec=pltpu.PrefetchScalarGridSpec(
            num_scalar_prefetch=0,
            grid=(B, S // tm, n_heads),
            in_specs=[
                pl.BlockSpec((None, None, tm, d_head), lambda b, m, h: (b, h, m, 0)),  # attn
                pl.BlockSpec((None, d_head, D), lambda b, m, h: (h, 0, 0)),            # W_out slice
                pl.BlockSpec((1, D), lambda b, m, h: (0, 0)),                          # b_out
            ],
            out_specs=pl.BlockSpec((None, tm, D), lambda b, m, h: (b, m, 0)),
            scratch_shapes=[pltpu.VMEM((tm, D), jnp.float32)],
        ),
        compiler_params=pltpu.CompilerParams(
            dimension_semantics=("parallel", "parallel", "arbitrary")),
    )(attn, w_out_heads, b_out2)

    return out


# --------------------------------------------------------------------------------------
# Pure-JAX reference (matches the PyTorch module semantics)
# --------------------------------------------------------------------------------------
def self_attention_ref(x, w_in, b_in, w_out, b_out, *, n_heads, causal_mask=False):
    B, S, D = x.shape
    d_head = D // n_heads
    qkv = jnp.einsum("bsd,ed->bse", x, w_in) + b_in
    q, k, v = jnp.split(qkv, 3, axis=-1)

    def heads(t):
        return t.reshape(B, S, n_heads, d_head).transpose(0, 2, 1, 3)

    q, k, v = heads(q), heads(k), heads(v)
    w = jnp.einsum("bhqd,bhkd->bhqk", q, k)
    if causal_mask:
        mask = jnp.triu(jnp.ones((S, S), bool), 1)
        w = jnp.where(mask[None, None], -jnp.inf, w)
    w = w / math.sqrt(d_head)
    w = jax.nn.softmax(w, axis=-1)
    o = jnp.einsum("bhqk,bhkd->bhqd", w, v)
    o = o.transpose(0, 2, 1, 3).reshape(B, S, D)
    return jnp.einsum("bsd,ed->bse", o, w_out) + b_out


if __name__ == "__main__":
    # Small shapes consistent with the module: batch=2, seq=8, d_embed=32, n_heads=4.
    B, S, D, H = 2, 8, 32, 4

    key = jax.random.PRNGKey(0)
    kx, kwi, kbi, kwo, kbo = jax.random.split(key, 5)

    x = jax.random.normal(kx, (B, S, D), dtype=jnp.float32)
    # PyTorch nn.Linear shapes: weight (out, in), bias (out,).
    w_in = jax.random.normal(kwi, (3 * D, D), dtype=jnp.float32) * 0.05
    b_in = jax.random.normal(kbi, (3 * D,), dtype=jnp.float32) * 0.05
    w_out = jax.random.normal(kwo, (D, D), dtype=jnp.float32) * 0.05
    b_out = jax.random.normal(kbo, (D,), dtype=jnp.float32) * 0.05

    # One-time parameter preparation (transpose / head-split of weights hoisted out of calls).
    params = prepare_params(w_in, b_in, w_out, b_out, n_heads=H)

    ok = True
    for causal in (False, True):
        out = self_attention(x, params, n_heads=H, causal_mask=causal)
        out = jax.block_until_ready(out)
        ref = self_attention_ref(x, w_in, b_in, w_out, b_out, n_heads=H, causal_mask=causal)
        # Tolerance loosened slightly vs a pure-f32 path: the softmax denominator uses the
        # EUP approximate reciprocal (pl.reciprocal(approx=True)); accumulation stays f32.
        ok = ok and bool(jnp.allclose(out, ref, atol=2e-3, rtol=2e-3))

    print("KERNEL_OK" if ok else "KERNEL_MISMATCH")
</pallas_src>

<mosaic_0001>
module attributes {stable_mosaic.version = 11 : i64} {
  func.func @_qkv_proj_kernel(%arg0: i32, %arg1: i32, %arg2: i32, %arg3: memref<1x8x32xf32, #tpu.memory_space<vmem>>, %arg4: memref<32x96xf32, #tpu.memory_space<vmem>>, %arg5: memref<1x96xf32, #tpu.memory_space<vmem>>, %arg6: memref<1x4x8x8xf32, #tpu.memory_space<vmem>>, %arg7: memref<1x4x8x8xf32, #tpu.memory_space<vmem>>, %arg8: memref<1x4x8x8xf32, #tpu.memory_space<vmem>>, %arg9: memref<8x96xf32, #tpu.memory_space<vmem>>) attributes {dimension_semantics = [#tpu.dimension_semantics<parallel>, #tpu.dimension_semantics<parallel>, #tpu.dimension_semantics<arbitrary>], iteration_bounds = array<i64: 2, 1, 1>, scalar_prefetch = 0 : i64, scratch_operands = 1 : i64, tpu.core_type = #tpu.core_type<tc>, window_params = [{transform_indices = @transform_0, window_bounds = array<i64: 1, 8, 32>}, {transform_indices = @transform_1, window_bounds = array<i64: 32, 96>}, {pipeline_mode = #tpu.pipeline_mode<synchronous>, transform_indices = @transform_2, window_bounds = array<i64: 1, 96>}, {transform_indices = @transform_3, window_bounds = array<i64: 1, 4, 8, 8>}, {transform_indices = @transform_4, window_bounds = array<i64: 1, 4, 8, 8>}, {transform_indices = @transform_5, window_bounds = array<i64: 1, 4, 8, 8>}]} {
    %c0_i32 = arith.constant 0 : i32
    %0 = arith.cmpi eq, %arg2, %c0_i32 : i32
    %1 = arith.extui %0 : i1 to i32
    %c0_i32_0 = arith.constant 0 : i32
    %2 = arith.cmpi ne, %1, %c0_i32_0 : i32
    scf.if %2 {
      %cst_11 = arith.constant 0.000000e+00 : f32
      %13 = vector.broadcast %cst_11 : f32 to vector<8x96xf32>
      %c0_12 = arith.constant 0 : index
      %c0_13 = arith.constant 0 : index
      %14 = vector.load %arg9[%c0_12, %c0_13] : memref<8x96xf32, #tpu.memory_space<vmem>>, vector<8x96xf32>
      tpu.vector_store %arg9[%c0_12, %c0_13], %13 {strides = array<i32>} : memref<8x96xf32, #tpu.memory_space<vmem>>, vector<8x96xf32>,
    } else {
    }
    %c0 = arith.constant 0 : index
    %c0_1 = arith.constant 0 : index
    %3 = vector.load %arg9[%c0, %c0_1] : memref<8x96xf32, #tpu.memory_space<vmem>>, vector<8x96xf32>
    %c0_2 = arith.constant 0 : index
    %c0_3 = arith.constant 0 : index
    %c0_4 = arith.constant 0 : index
    %4 = vector.load %arg3[%c0_2, %c0_3, %c0_4] : memref<1x8x32xf32, #tpu.memory_space<vmem>>, vector<1x8x32xf32>
    %5 = vector.shape_cast %4 : vector<1x8x32xf32> to vector<8x32xf32>
    %c0_5 = arith.constant 0 : index
    %c0_6 = arith.constant 0 : index
    %6 = vector.load %arg4[%c0_5, %c0_6] : memref<32x96xf32, #tpu.memory_space<vmem>>, vector<32x96xf32>
    %cst = arith.constant dense<0.000000e+00> : vector<8x96xf32>
    %7 = tpu.matmul %5, %6, %cst {dimension_numbers = #tpu.dot_dimension_numbers<[1], [0], [0], [1], [0, 0, 1, 1], [], []>} : vector<8x32xf32>, vector<32x96xf32>, vector<8x96xf32> -> vector<8x96xf32>
    %8 = arith.addf %3, %7 : vector<8x96xf32>
    %c0_7 = arith.constant 0 : index
    %c0_8 = arith.constant 0 : index
    %9 = vector.load %arg9[%c0_7, %c0_8] : memref<8x96xf32, #tpu.memory_space<vmem>>, vector<8x96xf32>
    tpu.vector_store %arg9[%c0_7, %c0_8], %8 {strides = array<i32>} : memref<8x96xf32, #tpu.memory_space<vmem>>, vector<8x96xf32>,
    %c0_i32_9 = arith.constant 0 : i32
    %10 = arith.cmpi eq, %arg2, %c0_i32_9 : i32
    %11 = arith.extui %10 : i1 to i32
    %c0_i32_10 = arith.constant 0 : i32
    %12 = arith.cmpi ne, %11, %c0_i32_10 : i32
    scf.if %12 {
      %c0_11 = arith.constant 0 : index
      %c0_12 = arith.constant 0 : index
      %13 = vector.load %arg9[%c0_11, %c0_12] : memref<8x96xf32, #tpu.memory_space<vmem>>, vector<8x96xf32>
      %c0_13 = arith.constant 0 : index
      %c0_14 = arith.constant 0 : index
      %14 = vector.load %arg5[%c0_13, %c0_14] : memref<1x96xf32, #tpu.memory_space<vmem>>, vector<1x96xf32>
      %15 = vector.broadcast %14 : vector<1x96xf32> to vector<8x96xf32>
      %16 = arith.addf %13, %15 : vector<8x96xf32>
      %17 = vector.extract_strided_slice %16 {offsets = [0, 0], sizes = [8, 8], strides = [1, 1]} : vector<8x96xf32> to vector<8x8xf32>
      %cst_15 = arith.constant 0.353553385 : f32
      %18 = vector.broadcast %cst_15 : f32 to vector<8x8xf32>
      %19 = arith.mulf %17, %18 : vector<8x8xf32>
      %c0_16 = arith.constant 0 : index
      %c0_17 = arith.constant 0 : index
      %c0_18 = arith.constant 0 : index
      %c0_19 = arith.constant 0 : index
      %20 = vector.load %arg6[%c0_16, %c0_17, %c0_18, %c0_19] : memref<1x4x8x8xf32, #tpu.memory_space<vmem>>, vector<1x1x8x8xf32>
      %21 = vector.shape_cast %20 : vector<1x1x8x8xf32> to vector<8x8xf32>
      %22 = vector.shape_cast %19 : vector<8x8xf32> to vector<1x1x8x8xf32>
      tpu.vector_store %arg6[%c0_16, %c0_17, %c0_18, %c0_19], %22 {strides = array<i32>} : memref<1x4x8x8xf32, #tpu.memory_space<vmem>>, vector<1x1x8x8xf32>,
      %23 = vector.extract_strided_slice %16 {offsets = [0, 32], sizes = [8, 8], strides = [1, 1]} : vector<8x96xf32> to vector<8x8xf32>
      %c0_20 = arith.constant 0 : index
      %c0_21 = arith.constant 0 : index
      %c0_22 = arith.constant 0 : index
      %c0_23 = arith.constant 0 : index
      %24 = vector.load %arg7[%c0_20, %c0_21, %c0_22, %c0_23] : memref<1x4x8x8xf32, #tpu.memory_space<vmem>>, vector<1x1x8x8xf32>
      %25 = vector.shape_cast %24 : vector<1x1x8x8xf32> to vector<8x8xf32>
      %26 = vector.shape_cast %23 : vector<8x8xf32> to vector<1x1x8x8xf32>
      tpu.vector_store %arg7[%c0_20, %c0_21, %c0_22, %c0_23], %26 {strides = array<i32>} : memref<1x4x8x8xf32, #tpu.memory_space<vmem>>, vector<1x1x8x8xf32>,
      %27 = vector.extract_strided_slice %16 {offsets = [0, 64], sizes = [8, 8], strides = [1, 1]} : vector<8x96xf32> to vector<8x8xf32>
      %c0_24 = arith.constant 0 : index
      %c0_25 = arith.constant 0 : index
      %c0_26 = arith.constant 0 : index
      %c0_27 = arith.constant 0 : index
      %28 = vector.load %arg8[%c0_24, %c0_25, %c0_26, %c0_27] : memref<1x4x8x8xf32, #tpu.memory_space<vmem>>, vector<1x1x8x8xf32>
      %29 = vector.shape_cast %28 : vector<1x1x8x8xf32> to vector<8x8xf32>
      %30 = vector.shape_cast %27 : vector<8x8xf32> to vector<1x1x8x8xf32>
      tpu.vector_store %arg8[%c0_24, %c0_25, %c0_26, %c0_27], %30 {strides = array<i32>} : memref<1x4x8x8xf32, #tpu.memory_space<vmem>>, vector<1x1x8x8xf32>,
      %31 = vector.extract_strided_slice %16 {offsets = [0, 8], sizes = [8, 8], strides = [1, 1]} : vector<8x96xf32> to vector<8x8xf32>
      %cst_28 = arith.constant 0.353553385 : f32
      %32 = vector.broadcast %cst_28 : f32 to vector<8x8xf32>
      %33 = arith.mulf %31, %32 : vector<8x8xf32>
      %c0_29 = arith.constant 0 : index
      %c1 = arith.constant 1 : index
      %c0_30 = arith.constant 0 : index
      %c0_31 = arith.constant 0 : index
      %34 = vector.load %arg6[%c0_29, %c1, %c0_30, %c0_31] : memref<1x4x8x8xf32, #tpu.memory_space<vmem>>, vector<1x1x8x8xf32>
      %35 = vector.shape_cast %34 : vector<1x1x8x8xf32> to vector<8x8xf32>
      %36 = vector.shape_cast %33 : vector<8x8xf32> to vector<1x1x8x8xf32>
      tpu.vector_store %arg6[%c0_29, %c1, %c0_30, %c0_31], %36 {strides = array<i32>} : memref<1x4x8x8xf32, #tpu.memory_space<vmem>>, vector<1x1x8x8xf32>,
      %37 = vector.extract_strided_slice %16 {offsets = [0, 40], sizes = [8, 8], strides = [1, 1]} : vector<8x96xf32> to vector<8x8xf32>
      %c0_32 = arith.constant 0 : index
      %c1_33 = arith.constant 1 : index
      %c0_34 = arith.constant 0 : index
      %c0_35 = arith.constant 0 : index
      %38 = vector.load %arg7[%c0_32, %c1_33, %c0_34, %c0_35] : memref<1x4x8x8xf32, #tpu.memory_space<vmem>>, vector<1x1x8x8xf32>
      %39 = vector.shape_cast %38 : vector<1x1x8x8xf32> to vector<8x8xf32>
      %40 = vector.shape_cast %37 : vector<8x8xf32> to vector<1x1x8x8xf32>
      tpu.vector_store %arg7[%c0_32, %c1_33, %c0_34, %c0_35], %40 {strides = array<i32>} : memref<1x4x8x8xf32, #tpu.memory_space<vmem>>, vector<1x1x8x8xf32>,
      %41 = vector.extract_strided_slice %16 {offsets = [0, 72], sizes = [8, 8], strides = [1, 1]} : vector<8x96xf32> to vector<8x8xf32>
      %c0_36 = arith.constant 0 : index
      %c1_37 = arith.constant 1 : index
      %c0_38 = arith.constant 0 : index
      %c0_39 = arith.constant 0 : index
      %42 = vector.load %arg8[%c0_36, %c1_37, %c0_38, %c0_39] : memref<1x4x8x8xf32, #tpu.memory_space<vmem>>, vector<1x1x8x8xf32>
      %43 = vector.shape_cast %42 : vector<1x1x8x8xf32> to vector<8x8xf32>
      %44 = vector.shape_cast %41 : vector<8x8xf32> to vector<1x1x8x8xf32>
      tpu.vector_store %arg8[%c0_36, %c1_37, %c0_38, %c0_39], %44 {strides = array<i32>} : memref<1x4x8x8xf32, #tpu.memory_space<vmem>>, vector<1x1x8x8xf32>,
      %45 = vector.extract_strided_slice %16 {offsets = [0, 16], sizes = [8, 8], strides = [1, 1]} : vector<8x96xf32> to vector<8x8xf32>
      %cst_40 = arith.constant 0.353553385 : f32
      %46 = vector.broadcast %cst_40 : f32 to vector<8x8xf32>
      %47 = arith.mulf %45, %46 : vector<8x8xf32>
      %c0_41 = arith.constant 0 : index
      %c2 = arith.constant 2 : index
      %c0_42 = arith.constant 0 : index
      %c0_43 = arith.constant 0 : index
      %48 = vector.load %arg6[%c0_41, %c2, %c0_42, %c0_43] : memref<1x4x8x8xf32, #tpu.memory_space<vmem>>, vector<1x1x8x8xf32>
      %49 = vector.shape_cast %48 : vector<1x1x8x8xf32> to vector<8x8xf32>
      %50 = vector.shape_cast %47 : vector<8x8xf32> to vector<1x1x8x8xf32>
      tpu.vector_store %arg6[%c0_41, %c2, %c0_42, %c0_43], %50 {strides = array<i32>} : memref<1x4x8x8xf32, #tpu.memory_space<vmem>>, vector<1x1x8x8xf32>,
      %51 = vector.extract_strided_slice %16 {offsets = [0, 48], sizes = [8, 8], strides = [1, 1]} : vector<8x96xf32> to vector<8x8xf32>
      %c0_44 = arith.constant 0 : index
      %c2_45 = arith.constant 2 : index
      %c0_46 = arith.constant 0 : index
      %c0_47 = arith.constant 0 : index
      %52 = vector.load %arg7[%c0_44, %c2_45, %c0_46, %c0_47] : memref<1x4x8x8xf32, #tpu.memory_space<vmem>>, vector<1x1x8x8xf32>
      %53 = vector.shape_cast %52 : vector<1x1x8x8xf32> to vector<8x8xf32>
      %54 = vector.shape_cast %51 : vector<8x8xf32> to vector<1x1x8x8xf32>
      tpu.vector_store %arg7[%c0_44, %c2_45, %c0_46, %c0_47], %54 {strides = array<i32>} : memref<1x4x8x8xf32, #tpu.memory_space<vmem>>, vector<1x1x8x8xf32>,
      %55 = vector.extract_strided_slice %16 {offsets = [0, 80], sizes = [8, 8], strides = [1, 1]} : vector<8x96xf32> to vector<8x8xf32>
      %c0_48 = arith.constant 0 : index
      %c2_49 = arith.constant 2 : index
      %c0_50 = arith.constant 0 : index
      %c0_51 = arith.constant 0 : index
      %56 = vector.load %arg8[%c0_48, %c2_49, %c0_50, %c0_51] : memref<1x4x8x8xf32, #tpu.memory_space<vmem>>, vector<1x1x8x8xf32>
      %57 = vector.shape_cast %56 : vector<1x1x8x8xf32> to vector<8x8xf32>
      %58 = vector.shape_cast %55 : vector<8x8xf32> to vector<1x1x8x8xf32>
      tpu.vector_store %arg8[%c0_48, %c2_49, %c0_50, %c0_51], %58 {strides = array<i32>} : memref<1x4x8x8xf32, #tpu.memory_space<vmem>>, vector<1x1x8x8xf32>,
      %59 = vector.extract_strided_slice %16 {offsets = [0, 24], sizes = [8, 8], strides = [1, 1]} : vector<8x96xf32> to vector<8x8xf32>
      %cst_52 = arith.constant 0.353553385 : f32
      %60 = vector.broadcast %cst_52 : f32 to vector<8x8xf32>
      %61 = arith.mulf %59, %60 : vector<8x8xf32>
      %c0_53 = arith.constant 0 : index
      %c3 = arith.constant 3 : index
      %c0_54 = arith.constant 0 : index
      %c0_55 = arith.constant 0 : index
      %62 = vector.load %arg6[%c0_53, %c3, %c0_54, %c0_55] : memref<1x4x8x8xf32, #tpu.memory_space<vmem>>, vector<1x1x8x8xf32>
      %63 = vector.shape_cast %62 : vector<1x1x8x8xf32> to vector<8x8xf32>
      %64 = vector.shape_cast %61 : vector<8x8xf32> to vector<1x1x8x8xf32>
      tpu.vector_store %arg6[%c0_53, %c3, %c0_54, %c0_55], %64 {strides = array<i32>} : memref<1x4x8x8xf32, #tpu.memory_space<vmem>>, vector<1x1x8x8xf32>,
      %65 = vector.extract_strided_slice %16 {offsets = [0, 56], sizes = [8, 8], strides = [1, 1]} : vector<8x96xf32> to vector<8x8xf32>
      %c0_56 = arith.constant 0 : index
      %c3_57 = arith.constant 3 : index
      %c0_58 = arith.constant 0 : index
      %c0_59 = arith.constant 0 : index
      %66 = vector.load %arg7[%c0_56, %c3_57, %c0_58, %c0_59] : memref<1x4x8x8xf32, #tpu.memory_space<vmem>>, vector<1x1x8x8xf32>
      %67 = vector.shape_cast %66 : vector<1x1x8x8xf32> to vector<8x8xf32>
      %68 = vector.shape_cast %65 : vector<8x8xf32> to vector<1x1x8x8xf32>
      tpu.vector_store %arg7[%c0_56, %c3_57, %c0_58, %c0_59], %68 {strides = array<i32>} : memref<1x4x8x8xf32, #tpu.memory_space<vmem>>, vector<1x1x8x8xf32>,
      %69 = vector.extract_strided_slice %16 {offsets = [0, 88], sizes = [8, 8], strides = [1, 1]} : vector<8x96xf32> to vector<8x8xf32>
      %c0_60 = arith.constant 0 : index
      %c3_61 = arith.constant 3 : index
      %c0_62 = arith.constant 0 : index
      %c0_63 = arith.constant 0 : index
      %70 = vector.load %arg8[%c0_60, %c3_61, %c0_62, %c0_63] : memref<1x4x8x8xf32, #tpu.memory_space<vmem>>, vector<1x1x8x8xf32>
      %71 = vector.shape_cast %70 : vector<1x1x8x8xf32> to vector<8x8xf32>
      %72 = vector.shape_cast %69 : vector<8x8xf32> to vector<1x1x8x8xf32>
      tpu.vector_store %arg8[%c0_60, %c3_61, %c0_62, %c0_63], %72 {strides = array<i32>} : memref<1x4x8x8xf32, #tpu.memory_space<vmem>>, vector<1x1x8x8xf32>,
    } else {
    }
    return
  }
  func.func @transform_0(%arg0: i32, %arg1: i32, %arg2: i32) -> (i32, i32, i32) {
    %c0_i32 = arith.constant 0 : i32
    return %arg0, %arg1, %arg2 : i32, i32, i32
  }
  func.func @transform_1(%arg0: i32, %arg1: i32, %arg2: i32) -> (i32, i32) {
    %c0_i32 = arith.constant 0 : i32
    %c0_i32_0 = arith.constant 0 : i32
    return %arg2, %c0_i32 : i32, i32
  }
  func.func @transform_2(%arg0: i32, %arg1: i32, %arg2: i32) -> (i32, i32) {
    %c0_i32 = arith.constant 0 : i32
    %c0_i32_0 = arith.constant 0 : i32
    %c0_i32_1 = arith.constant 0 : i32
    return %c0_i32, %c0_i32_0 : i32, i32
  }
  func.func @transform_3(%arg0: i32, %arg1: i32, %arg2: i32) -> (i32, i32, i32, i32) {
    %c0_i32 = arith.constant 0 : i32
    %c0_i32_0 = arith.constant 0 : i32
    %c0_i32_1 = arith.constant 0 : i32
    return %arg0, %c0_i32, %arg1, %c0_i32_0 : i32, i32, i32, i32
  }
  func.func @transform_4(%arg0: i32, %arg1: i32, %arg2: i32) -> (i32, i32, i32, i32) {
    %c0_i32 = arith.constant 0 : i32
    %c0_i32_0 = arith.constant 0 : i32
    %c0_i32_1 = arith.constant 0 : i32
    return %arg0, %c0_i32, %arg1, %c0_i32_0 : i32, i32, i32, i32
  }
  func.func @transform_5(%arg0: i32, %arg1: i32, %arg2: i32) -> (i32, i32, i32, i32) {
    %c0_i32 = arith.constant 0 : i32
    %c0_i32_0 = arith.constant 0 : i32
    %c0_i32_1 = arith.constant 0 : i32
    return %arg0, %c0_i32, %arg1, %c0_i32_0 : i32, i32, i32, i32
  }
}

</mosaic_0001>

<bundles_post_ra>
// kernel: tpu_custom_call.1
= control target key start
LH: loop header
LB: loop body
LE: loop exit
PB: predicated region body
PF: predicated region fallthrough
CT: control target
= control target key end

     0   :  { %s1287_s0 = inlined_call_operand.hbm [shape: f32[2,8,32], index: 0, kind: input, shape index: {}]   ;;  %s1288_s1 = inlined_call_operand.hbm [shape: f32[32,96], index: 1, kind: input, shape index: {}]   ;;  %s1289_s2 = inlined_call_operand.vmem [shape: f32[1,96], index: 2, kind: input, shape index: {}]   ;;  %s1290_s3 = inlined_call_operand.hbm [shape: f32[2,4,8,8], index: 3, kind: output, shape index: {0}]   ;;  %s1291_s4 = inlined_call_operand.hbm [shape: f32[2,4,8,8], index: 4, kind: output, shape index: {1}]   ;;  %s1292_s5 = inlined_call_operand.hbm [shape: f32[2,4,8,8], index: 5, kind: output, shape index: {2}]  }
   0x1   :  { %1296 = sst [smem:[#allocation16_spill]] %s1287_s0 }
   0x2   :  { %11 = vsyncpa [#allocation4], 0 }
   0x3   :  { %13 = vsyncpa [#allocation4 + $0x1], 0 }
   0x4   :  { %14 = vsyncpa [#allocation7], 0 }
   0x5   :  { %15 = vsyncpa [#allocation5], 0 }
   0x6   :  { %17 = vsyncpa [#allocation5 + $0x1], 0 }
   0x7   :  { %18 = vsyncpa [#allocation10], 0 }
   0x8   :  { %20 = vsyncpa [#allocation10 + $0x1], 0  ;;  %s1045_s18 = smov 0   ;;  %s1047_s19 = smov 0  }
   0x9   :  { %s1049_s20 = smov 0   ;;  %s1051_s21 = smov 0  }
   0xa   :  { %s1053_s22 = smov 0   ;;  %s1055_s23 = smov 0  }
   0xb LB: > { %s1076_s24 = sadd.s32 4294967295, %s996_s23   ;;  %p655_p0 = scmp.ge.s32.totalorder %s996_s23, 1  ;;  %s996_s23 = sphi %s1055_s23, %s26_s23   ;;  %s992_s22 = sphi %s1053_s22, %s1309_s22   ;;  %s988_s21 = sphi %s1051_s21, %s1308_s21   ;;  %s984_s20 = sphi %s1049_s20, %s1307_s20   ;;  %s980_s19 = sphi %s1047_s19, %s1306_s19   ;;  %s976_s18 = sphi %s1045_s18, %s1305_s18  }
   0xc   : > { %p70_p1 = scmp.eq.s32.totalorder %s1076_s24, 0  ;;  %p211_p2 = scmp.lt.s32.totalorder %s996_s23, 3 }
   0xd   : > { %s225_s27 = sshll.u32 %s1288_s1, 4  ;;  %s998_s29 = smov [#allocation6]   ;;  %s226_s27 = int_to_ptr.hbm [resolvable:$true] %s225_s27 }
   0xe   : > { %p1084_p3 = pnand %p655_p0, %p211_p2  ;;  %s227_s30 = sshll.u32 %s998_s29, 4  ;;  %s228_s30 = int_to_ptr.vmem [resolvable:$true] %s227_s30 }
   0xf   : > { %p657_p6 = scmp.ge.s32.totalorder %s996_s23, 2  ;;  %s999_s6 = smov 128  }
  0x10   : > { %p702_p4 = pneg %p1084_p3  ;;  %s1000_s7 = smov 8  }
  0x11   : > { %s1293_s8 = sadd.s32 4294967294, %s996_s23   ;;  %s45_s9 = sadd.s32 1, %s992_s22 }
  0x12   : > { %p703_p5 = pnand %p702_p4, %p70_p1  ;;  %s56_s10 = sadd.s32 1, %s984_s20 }
  0x13   : > { %p47_p7 = scmp.ge.s32.totalorder %s45_s9, 2  ;;  %p63_p8 = scmp.ne.s32.totalorder %s984_s20, %s980_s19 }
  0x14   : > { %705 = dma.hbm_to_vmem [thread:$0]  (!%p703_p5), %s226_s27, 512, %s228_s30, [#allocation7], %s999_s6, %s999_s6, %s1000_s7  }
  0x15   : > { %p64_p9 = scmp.eq.s32.totalorder %s996_s23, 0  ;;  %p69_p10 = scmp.ne.s32.totalorder %s980_s19, %s976_s18 }
  0x16   : > { %s1311_s9 = smov (%p47_p7, %s45_s9), 0  ;;  %p142_p13 = scmp.eq.s32.totalorder %s1076_s24, 1 }
  0x17   : > { %p1103_p11 = por %p64_p9, %p63_p8  ;;  %p1109_p12 = por %p70_p1, %p69_p10 }
  0x18   : > { %s49_s13 = ssub.s32 %s992_s22, %s1311_s9  ;;  %p148_p2 = scmp.eq.s32.totalorder %s1293_s8, 1 }
  0x19   : > { %p54_p0 = scmp.eq.s32.totalorder %s49_s13, 0  ;;  %p1118_p4 = por %p142_p13, %p63_p8 }
  0x1a   : > { %p721_p5 = scmp.lt.s32.totalorder %s996_s23, 2  ;;  %p1126_p7 = por %p148_p2, %p69_p10 }
  0x1b   : > { %s1124_s15 = scalar_select %p54_p0, %s984_s20, %s56_s10  }
  0x1c   : > { %s244_s17 = sand.u32 1, %s984_s20   ;;  %s659_s26 = sshll.u32 %s992_s22, 3 }
  0x1d   : > { %s658_s25 = sshll.u32 %s244_s17, 3  ;;  %s1302_s0 = sld [smem:[#allocation16_spill]] }
  0x1e   : > { %s248_s6 = scalar_lea.vmem [#allocation3], %s658_s25  ;;  %p707_p8 = pnand %p721_p5, %p1103_p11 }
  0x1f   : > { %s258_s7 = sshll.u32 %s248_s6, 4  ;;  %s245_s10 = scalar_lea.sflag [#allocation4], %s244_s17  ;;  %s259_s7 = int_to_ptr.vmem [resolvable:$true] %s258_s7 }
  0x20   : > { %s1140_s8 = sand.u32 (!%p1084_p3), 1, %s980_s19  }
  0x21   : > { %267 = sbr.rel (%p1084_p3) target bundleno = 342 (0x156), region = 32  ;;  %s661_s27 = sshll.u32 (!%p1084_p3), %s1140_s8, 3 }
  0x22   : > { %s273_s25 = scalar_lea.vmem (!%p1084_p3), [#allocation3], %s661_s27 }
  0x23   : > { %s254_s30 = scalar_lea.hbm %s1302_s0, %s659_s26  ;;  %s270_s26 = scalar_lea.sflag (!%p1084_p3), [#allocation4], %s1140_s8 }
  0x24   : > { %s256_s13 = sshll.u32 %s254_s30, 4  ;;  %s257_s13 = int_to_ptr.hbm [resolvable:$true] %s256_s13 }
  0x25   : > { %709 = dma.hbm_to_vmem [thread:$0]  (!%p707_p8), %s257_s13, 128, %s259_s7, %s245_s10  }
  0x26   : > { %959 = dma.done.wait (%p1109_p12), %s270_s26, 128  }
  0x27   : > { %961 = vsyncadd (%p1109_p12), %s270_s26, 4294967168 }
  0x28   : > { %963 = dma.done.wait (%p70_p1), [#allocation7], 512  }
  0x29   : > { %965 = vsyncadd (%p70_p1), [#allocation7], 4294966784  ;;  %vm321_vm0 = vcmask 785408   ;;  %v1001_v0 = vmov 0.0   ;;  %v328_v1 = vld [vmem:[#allocation6 + $0x18] sm:$0xff]  ;;  %v327_v2 = vld [vmem:[#allocation6 + $0x10] sm:$0xff] }
  0x2a   : > { %322 = vst.msk [vmem:[#allocation2] sm:$0xff] %vm321_vm0, %v1001_v0  ;;  %345 = vmatpush.msra.mxu0 %v328_v1  ;;  %v326_v3 = vld [vmem:[#allocation6 + $0x8] sm:$0xff]  ;;  %v325_v4 = vld [vmem:[#allocation6] sm:$0xff]  ;;  %v324_v5 = vld [vmem:[%s273_s25] sm:$0xff]  ;;  %vm329_vm1 = vcmask 261120   ;;  %s1158_s12 = sshll.u32 %s1140_s8, 5 }
  0x2b   : > { %v789_v9 = vld [vmem:[%s1289_s2] ss:$0 sm:$0xff]  ;;  %vm366_vm2 = vcmask 64512   ;;  %s1002_s17 = smov 64   ;;  %s1003_s29 = smov 80  }
  0x2c   : > { %346 = vmatpush.msra.mxu0 %v327_v2  ;;  %s1004_s30 = smov 96   ;;  %s1161_s6 = scalar_lea.vmem [#allocation8], %s1158_s12 }
  0x2d   : > { %s1005_s7 = smov 72   ;;  %s1006_s13 = smov 120  }
  0x2e   : > { %347 = vmatpush.msra.mxu0 %v326_v3  ;;  %s1007_s10 = smov 88   ;;  %s1008_s27 = smov 112  }
  0x2f   : > { %s1009_s26 = smov 48   ;;  %s1010_s25 = smov 56  }
  0x30   : > { %348 = vmatpush.msra.mxu0 %v325_v4  ;;  %s1011_s28 = smov 40   ;;  %s1012_s11 = smov 104  }
  0x31   : > { %666 = vmatmul.msk.f32.vlgmr.msra.gmra.mxu0 %vm329_vm1, %v324_v5  ;;  %v323_v6 = vld [vmem:[#allocation2] sm:$0xff] }
  0xae   : > { %v350_v7 = vpop.f32.mrf.mxu0 }
  0xaf   : > { %v353_v8 = vadd.f32 %v350_v7, %v323_v6 }
  0xb1   : > { %355 = vst.msk [vmem:[#allocation2] sm:$0xff] %vm321_vm0, %v353_v8 }
  0xb8   : > { %v359_v10 = vld [vmem:[#allocation2] sm:$0xff] }
  0xb9   : > { %v364_v11 = vadd.f32 %v789_v9, %v359_v10 }
  0xbb   : > { %373 = vrot.lane.b32.xlu2 %v364_v11, %s1002_s17  ;;  %398 = vrot.lane.b32.xlu1 %v364_v11, %s1003_s29  ;;  %v365_v12 = vmul.f32 0.35355338, %v364_v11  ;;  %s1166_s17 = scalar_lea.vmem [#allocation11], %s1158_s12  ;;  %s1175_s29 = sshll.u32 %s988_s21, 5 }
  0xbc   : > { %369 = vrot.lane.b32.xlu0 %v364_v11, %s1004_s30  ;;  %s308_s30 = scalar_lea.vmem [#allocation9], %s1158_s12 }
  0xbd   : > { %367 = vst.msk [vmem:[%s1161_s6] sm:$0xff] %vm366_vm2, %v365_v12 }
  0xc3   : > { %413 = vrot.lane.b32.xlu1 %v364_v11, %s1005_s7  ;;  %378 = vrot.lane.b32.xlu2 %v365_v12, %s1006_s13  ;;  %s870_s7 = scalar_lea.hbm %s1291_s4, 64 }
  0xc4   : > { %383 = vrot.lane.b32.xlu0 %v364_v11, %s1007_s10  ;;  %s464_s10 = scalar_lea.hbm %s1291_s4, %s1175_s29 }
  0xcb   : > { %393 = vrot.lane.b32.xlu1 %v365_v12, %s1008_s27  ;;  %403 = vrot.lane.b32.xlu2 %v364_v11, %s1009_s26  ;;  %s465_s27 = sshll.u32 %s308_s30, 4  ;;  %s428_s26 = sand.u32 1, %s1076_s24   ;;  %s466_s27 = int_to_ptr.vmem [resolvable:$true] %s465_s27 }
  0xcc   : > { %388 = vrot.lane.b32.xlu0 %v364_v11, %s1010_s25  ;;  %s467_s25 = sshll.u32 %s464_s10, 4  ;;  %s1187_s21 = scalar_lea.sflag [#allocation10], %s428_s26  ;;  %s468_s25 = int_to_ptr.hbm [resolvable:$true] %s467_s25 }
  0xcd   : > { %s864_s12 = sshra.s32 %s468_s25, 4  ;;  %s865_s12 = int_to_ptr.hbm [resolvable:$true] %s864_s12 }
  0xce   : > { %p871_p10 = scmp.lt.s32.totalorder %s865_s12, %s1291_s4 }
  0xd3   : > { %418 = vrot.lane.b32.xlu1 %v364_v11, %s1011_s28  ;;  %s866_s28 = scalar_lea.hbm %s865_s12, 32 }
  0xd4   : > { %408 = vrot.lane.b32.xlu0 %v365_v12, %s1012_s11  ;;  %p867_p1 = scmp.ne.s32.totalorder %s865_s12, %s866_s28  ;;  %p872_p11 = scmp.lt.s32.totalorder %s870_s7, %s866_s28 }
  0xd6   : > { %p868_p3 = pnand %p867_p1, %p1118_p4  ;;  %p873_p12 = por %p872_p11, %p871_p10 }
  0xd8   : > { %p869_p9 = pneg %p868_p3 }
  0xda   : > { %p874_p13 = pnand %p873_p12, %p869_p9 }
 0x115   : > { %v374_v13 = vpop.permute.xlu2 %373 }
 0x116   : > { %376 = vst.msk [vmem:[%s1166_s17] sm:$0xff] %vm366_vm2, %v374_v13 }
 0x11d   : > { %v379_v14 = vpop.permute.xlu2 %378 }
 0x11e   : > { %667 = vst.msk [vmem:[%s1161_s6 + $0x8] sm:$0xff] %vm366_vm2, %v379_v14 }
 0x125   : > { %v404_v15 = vpop.permute.xlu2 %403 }
 0x126   : > { %672 = vst.msk [vmem:[%s1166_s17 + $0x10] sm:$0xff] %vm366_vm2, %v404_v15 }
 0x12d   : > { %v399_v16 = vpop.permute.xlu1 %398 }
 0x12e   : > { %671 = vst.msk [vmem:[%s308_s30 + $0x10] sm:$0xff] %vm366_vm2, %v399_v16  ;;  %v370_v17 = vpop.permute.xlu0 %369 }
 0x12f   : > { %372 = vst.msk [vmem:[%s308_s30] sm:$0xff] %vm366_vm2, %v370_v17 }
 0x135   : > { %v414_v18 = vpop.permute.xlu1 %413 }
 0x136   : > { %674 = vst.msk [vmem:[%s308_s30 + $0x18] sm:$0xff] %vm366_vm2, %v414_v18  ;;  %v384_v19 = vpop.permute.xlu0 %383 }
 0x137   : > { %668 = vst.msk [vmem:[%s308_s30 + $0x8] sm:$0xff] %vm366_vm2, %v384_v19 }
 0x138   : > { %877 = shalt.err (!%p874_p13)
}
 0x139   : > { %s1294_s30 = smov 128   ;;  %s1014_s26 = smov 8  }
 0x13a   : > { %697 = dma.vmem_to_hbm [thread:$0]  (%p1118_p4), %s466_s27, 512, %s468_s25, %s1187_s21, %s1294_s30, %s1294_s30, %s1014_s26  }
 0x13b   : > { %s446_s11 = scalar_lea.hbm %s1290_s3, %s1175_s29  ;;  %s482_s13 = scalar_lea.hbm %s1292_s5, %s1175_s29 }
 0x13c   : > { %s447_s10 = sshll.u32 %s1161_s6, 4  ;;  %s1216_s0 = sshll.u32 %s446_s11, 4  ;;  %s448_s10 = int_to_ptr.vmem [resolvable:$true] %s447_s10  ;;  %s450_s0 = int_to_ptr.hbm [resolvable:$true] %s1216_s0 }
 0x13d   : > { %v394_v20 = vpop.permute.xlu1 %393  ;;  %s483_s27 = sshll.u32 %s1166_s17, 4  ;;  %s1219_s25 = sshll.u32 %s482_s13, 4  ;;  %s1222_s27 = int_to_ptr.vmem [resolvable:$true] %s483_s27  ;;  %s486_s25 = int_to_ptr.hbm [resolvable:$true] %s1219_s25 }
 0x13e   : > { %v389_v21 = vpop.permute.xlu0 %388  ;;  %670 = vst.msk [vmem:[%s1161_s6 + $0x10] sm:$0xff] %vm366_vm2, %v394_v20  ;;  %s424_s29 = scalar_lea.sflag [#allocation5], %s1140_s8  ;;  %s892_s12 = sshra.s32 %s450_s0, 4  ;;  %s893_s12 = int_to_ptr.hbm [resolvable:$true] %s892_s12 }
 0x13f   : > { %669 = vst.msk [vmem:[%s1166_s17 + $0x8] sm:$0xff] %vm366_vm2, %v389_v21  ;;  %s894_s28 = scalar_lea.hbm %s893_s12, 32  ;;  %s898_s7 = scalar_lea.hbm %s1290_s3, 64 }
 0x140   : > { %p895_p0 = scmp.ne.s32.totalorder %s893_s12, %s894_s28  ;;  %p899_p8 = scmp.lt.s32.totalorder %s893_s12, %s1290_s3 }
 0x141   : > { %p900_p1 = scmp.lt.s32.totalorder %s898_s7, %s894_s28 }
 0x142   : > { %p896_p2 = pnand %p895_p0, %p1118_p4 }
 0x143   : > { %p901_p3 = por %p900_p1, %p899_p8 }
 0x144   : > { %p897_p5 = pneg %p896_p2 }
 0x145   : > { %v419_v22 = vpop.permute.xlu1 %418 }
 0x146   : > { %v409_v23 = vpop.permute.xlu0 %408  ;;  %675 = vst.msk [vmem:[%s1166_s17 + $0x18] sm:$0xff] %vm366_vm2, %v419_v22  ;;  %p902_p9 = pnand %p901_p3, %p897_p5 }
 0x147   : > { %673 = vst.msk [vmem:[%s1161_s6 + $0x18] sm:$0xff] %vm366_vm2, %v409_v23 }
 0x148   : > { %905 = shalt.err (!%p902_p9)
}
 0x149   : > { %s1303_s8 = smov 128   ;;  %s920_s6 = sshra.s32 %s486_s25, 4  ;;  %s921_s6 = int_to_ptr.hbm [resolvable:$true] %s920_s6 }
 0x14a   : > { %696 = dma.vmem_to_hbm [thread:$0]  (%p1118_p4), %s448_s10, 512, %s450_s0, %s424_s29, %s1303_s8, %s1303_s8, %s1014_s26  }
 0x14b   : > { %s922_s17 = scalar_lea.hbm %s921_s6, 32  ;;  %s926_s28 = scalar_lea.hbm %s1292_s5, 64 }
 0x14c   : > { %p923_p10 = scmp.ne.s32.totalorder %s921_s6, %s922_s17  ;;  %p927_p13 = scmp.lt.s32.totalorder %s921_s6, %s1292_s5 }
 0x14d   : > { %p928_p0 = scmp.lt.s32.totalorder %s926_s28, %s922_s17 }
 0x14e   : > { %p924_p11 = pnand %p923_p10, %p1118_p4 }
 0x14f   : > { %p929_p2 = por %p928_p0, %p927_p13 }
 0x150   : > { %p925_p12 = pneg %p924_p11 }
 0x152   : > { %p930_p5 = pnand %p929_p2, %p925_p12 }
 0x154   : > { %933 = shalt.err (!%p930_p5)
}
 0x155   : > { %698 = dma.vmem_to_hbm [thread:$0]  (%p1118_p4), %s1222_s27, 512, %s486_s25, %s1187_s21, %s1303_s8, %s1303_s8, %s1014_s26  }
 0x156 PF: > { %s500_s0 = sand.u32 1, %s976_s18   ;;  %p711_p8 = pnand %p657_p6, %p1126_p7 }
 0x157   : > { %s501_s10 = scalar_lea.sflag [#allocation5], %s500_s0 }
 0x158   : > { %p712_p1 = pneg %p711_p8 }
 0x15a   : > { %967 = dma.done.wait (%p712_p1), %s501_s10, 512  }
 0x15b   : > { %969 = vsyncadd (%p712_p1), %s501_s10, 4294966784  ;;  %s1304_s14 = sadd.s32 4294967294, %s996_s23  }
 0x15c   : > { %s510_s29 = sand.u32 1, %s1304_s14  }
 0x15d   : > { %s511_s7 = scalar_lea.sflag [#allocation10], %s510_s29 }
 0x15e   : > { %971 = dma.done.wait (%p712_p1), %s511_s7, 1024  }
 0x15f   : > { %973 = vsyncadd (%p712_p1), %s511_s7, 4294966272  ;;  %s26_s23 = sadd.s32 1, %s996_s23   ;;  %s1305_s18 = smov %s980_s19 }
 0x160   : > { %p23_p4 = scmp.ge.s32.totalorder %s26_s23, 4   ;;  %s1306_s19 = smov %s984_s20 }
 0x161   : > { %s1307_s20 = smov %s1124_s15  ;;  %s1308_s21 = smov %s992_s22 }
 0x162   : > { %s1309_s22 = smov %s1311_s9  ;;  %25 = sbr.rel (!%p23_p4) target bundleno = 11 (0xb), region = 131 }
 0x167   :  { %527 = vsyncpa [#allocation4], 1 }
 0x168   :  { %529 = vsyncpa [#allocation4 + $0x1], 1 }
 0x169   :  { %530 = vsyncpa [#allocation7], 1 }
 0x16a   :  { %531 = vsyncpa [#allocation5], 1 }
 0x16b   :  { %533 = vsyncpa [#allocation5 + $0x1], 1 }
 0x16c   :  { %534 = vsyncpa [#allocation10], 1 }
 0x16d   :  { %536 = vsyncpa [#allocation10 + $0x1], 1 }

</bundles_post_ra>
